<compile_context>
chip_gen: v7x
topology: tpu7x:2x2x1
jax: 0.10.0
libtpu: 0.0.40
codegen_flags: <defaults>
</compile_context>

<pallas_src>
import functools
import math

import jax
import jax.numpy as jnp
from jax import lax
from jax.experimental import pallas as pl
from jax.experimental.pallas import tpu as pltpu


# --------------------------------------------------------------------------
# generation-aware VMEM budget + tile picking
# --------------------------------------------------------------------------
def _vmem_limit_bytes():
    try:
        cap = int(pltpu.get_tpu_info().vmem_capacity_bytes)  # 64 MiB v7x, 128 MiB v5e/v6e
    except Exception:
        cap = 64 * 1024 * 1024                               # safe-everywhere fallback
    return int(cap * 3 // 4)


_VMEM_LIMIT = _vmem_limit_bytes()


def _pick_tile(dim, candidates):
    """Largest candidate that evenly divides dim; else fall back to the full dim."""
    for c in candidates:
        if c <= dim and dim % c == 0:
            return c
    return dim


# --------------------------------------------------------------------------
# tiled matmul: bf16 operands, f32 accumulation, bf16 output
# --------------------------------------------------------------------------
def _matmul_kernel(x_ref, w_ref, o_ref, acc_ref):
    @pl.when(pl.program_id(2) == 0)
    def _():
        acc_ref[...] = jnp.zeros_like(acc_ref)

    acc_ref[...] += jnp.dot(x_ref[...], w_ref[...],
                            preferred_element_type=jnp.float32)

    @pl.when(pl.program_id(2) == pl.num_programs(2) - 1)
    def _():
        o_ref[...] = acc_ref[...].astype(o_ref.dtype)


def linear(x2d, w, *, out_dtype=jnp.bfloat16):
    """y = x2d @ w with w stored as (in_features, out_features)."""
    M, K = x2d.shape
    K2, N = w.shape
    assert K == K2
    tm = _pick_tile(M, (256, 128, 64, 32, 16, 8))
    tn = _pick_tile(N, (512, 256, 128))
    tk = _pick_tile(K, (512, 256, 128))
    grid = (M // tm, N // tn, K // tk)
    return pl.pallas_call(
        _matmul_kernel,
        out_shape=jax.ShapeDtypeStruct((M, N), out_dtype),
        grid_spec=pltpu.PrefetchScalarGridSpec(
            num_scalar_prefetch=0,
            grid=grid,
            in_specs=[pl.BlockSpec((tm, tk), lambda i, j, k: (i, k)),
                      pl.BlockSpec((tk, tn), lambda i, j, k: (k, j))],
            out_specs=pl.BlockSpec((tm, tn), lambda i, j, k: (i, j)),
            scratch_shapes=[pltpu.VMEM((tm, tn), jnp.float32)]),
        compiler_params=pltpu.CompilerParams(
            dimension_semantics=("parallel", "parallel", "arbitrary"),
            vmem_limit_bytes=_VMEM_LIMIT),
    )(x2d.astype(jnp.bfloat16), w.astype(jnp.bfloat16))


# --------------------------------------------------------------------------
# flash-style multi-query attention (single shared K/V head)
# --------------------------------------------------------------------------
def _mqa_flash_kernel(q_ref, kt_ref, v_ref, o_ref, m_ref, l_ref, acc_ref,
                      *, scale, start_pos, n_head, tq, tk, head_dim):
    qi = pl.program_id(1)
    ki = pl.program_id(2)

    @pl.when(ki == 0)
    def _():
        m_ref[...] = jnp.full_like(m_ref, -jnp.inf)
        l_ref[...] = jnp.zeros_like(l_ref)
        acc_ref[...] = jnp.zeros_like(acc_ref)

    # Skip kv blocks that lie entirely in the causal future of this q block.
    @pl.when(ki * tk <= qi * tq + (tq - 1) + start_pos)
    def _():
        q = q_ref[0].reshape(n_head * tq, head_dim)                 # (H*tq, d) bf16
        s = jnp.dot(q, kt_ref[0],
                    preferred_element_type=jnp.float32) * scale     # (H*tq, tk) f32

        # causal mask built in-kernel from block indices (no HBM mask tensor)
        q_pos = qi * tq + lax.broadcasted_iota(jnp.int32, (tq, tk), 0)
        k_pos = ki * tk + lax.broadcasted_iota(jnp.int32, (tq, tk), 1)
        allowed = (k_pos <= q_pos + start_pos)[None, :, :]          # (1, tq, tk)
        s = jnp.where(allowed, s.reshape(n_head, tq, tk), -jnp.inf)
        s = s.reshape(n_head * tq, tk)

        m_prev = m_ref[...]
        m_new = jnp.maximum(m_prev, jnp.max(s, axis=-1, keepdims=True))
        alpha = jnp.exp(m_prev - m_new)
        p = jnp.exp(s - m_new)
        l_ref[...] = alpha * l_ref[...] + jnp.sum(p, axis=-1, keepdims=True)
        acc_ref[...] = alpha * acc_ref[...] + jnp.dot(
            p.astype(v_ref.dtype), v_ref[0],
            preferred_element_type=jnp.float32)
        m_ref[...] = m_new

    @pl.when(ki == pl.num_programs(2) - 1)
    def _():
        out = acc_ref[...] * pl.reciprocal(l_ref[...], approx=True)  # (H*tq, d) f32
        # Lane-dense output (tq, H*d): head h's contiguous row slab -> column slab,
        # fusing the (b, h, q, d) -> (b, q, h*d) transpose into the final store.
        for h in range(n_head):                                      # static unroll
            o_ref[0, :, h * head_dim:(h + 1) * head_dim] = (
                out[h * tq:(h + 1) * tq, :].astype(o_ref.dtype))


def mqa_flash_attention(q, kT, v, *, start_pos, out_dtype=jnp.bfloat16):
    """q: (b, n_head, S, d);  kT: (b, d, S) pre-transposed;  v: (b, S, d).
    Returns (b, S, n_head*d).  Causal mask (offset by start_pos) is applied in-kernel."""
    b, n_head, S, d = q.shape
    scale = 1.0 / math.sqrt(d)
    # bound H*tq so the (H*tq, tk) f32 score tile stays comfortably inside VMEM
    tq_cands = tuple(c for c in (256, 128, 64, 32, 16, 8) if c * n_head <= 2048) or (8,)
    tq = _pick_tile(S, tq_cands)
    tk = _pick_tile(S, (512, 256, 128))
    grid = (b, S // tq, S // tk)
    kernel = functools.partial(_mqa_flash_kernel, scale=scale, start_pos=start_pos,
                               n_head=n_head, tq=tq, tk=tk, head_dim=d)
    return pl.pallas_call(
        kernel,
        out_shape=jax.ShapeDtypeStruct((b, S, n_head * d), out_dtype),
        grid_spec=pltpu.PrefetchScalarGridSpec(
            num_scalar_prefetch=0,
            grid=grid,
            in_specs=[pl.BlockSpec((1, n_head, tq, d), lambda bb, qi, ki: (bb, 0, qi, 0)),
                      pl.BlockSpec((1, d, tk), lambda bb, qi, ki: (bb, 0, ki)),
                      pl.BlockSpec((1, tk, d), lambda bb, qi, ki: (bb, ki, 0))],
            out_specs=pl.BlockSpec((1, tq, n_head * d), lambda bb, qi, ki: (bb, qi, 0)),
            scratch_shapes=[pltpu.VMEM((n_head * tq, 1), jnp.float32),   # m
                            pltpu.VMEM((n_head * tq, 1), jnp.float32),   # l
                            pltpu.VMEM((n_head * tq, d), jnp.float32)]), # acc
        compiler_params=pltpu.CompilerParams(
            dimension_semantics=("parallel", "parallel", "arbitrary"),
            vmem_limit_bytes=_VMEM_LIMIT),
    )(q.astype(jnp.bfloat16), kT.astype(jnp.bfloat16), v.astype(jnp.bfloat16))


# --------------------------------------------------------------------------
# RoPE glue (GPT-NeoX style, base=10000 as in RotaryEmbedding)
# --------------------------------------------------------------------------
def _rope_cos_sin(seq_len, head_dim, base=10000.0):
    inv_freq = 1.0 / (base ** (jnp.arange(0, head_dim, 2, dtype=jnp.float32) / head_dim))
    t = jnp.arange(seq_len, dtype=jnp.float32)
    freqs = jnp.einsum("i,j->ij", t, inv_freq)
    emb = jnp.concatenate([freqs, freqs], axis=-1)          # (seq, head_dim)
    return jnp.cos(emb), jnp.sin(emb)


def _rotate_half(x):
    d = x.shape[-1]
    return jnp.concatenate([-x[..., d // 2:], x[..., :d // 2]], axis=-1)


# --------------------------------------------------------------------------
# FalconAttentionFused.forward (prefill path)
# --------------------------------------------------------------------------
def falcon_attention_fused(x, start_pos, wqkv, wdense, n_head):
    bsz, seqlen, hidden = x.shape
    head_dim = hidden // n_head
    assert seqlen > 1, "only the seqlen>1 prefill path is implemented"

    qkv = linear(x.reshape(bsz * seqlen, hidden), wqkv)             # Pallas tiled matmul
    qkv = qkv.reshape(bsz, seqlen, n_head + 2, head_dim)
    xq = qkv[:, :, :n_head, :]                                      # (b, s, H, d)
    xk = qkv[:, :, n_head, :]                                       # (b, s, d)  single KV head
    xv = qkv[:, :, n_head + 1, :]                                   # (b, s, d)

    # RoPE on q and k; values are not rotated.
    # TODO(synk): fuse the QKV split + RoPE + head transpose into the attention kernel
    #             (pltpu.roll for rotate_half) to remove these extra HBM passes.
    cos, sin = _rope_cos_sin(seqlen, head_dim)
    q = jnp.transpose(xq, (0, 2, 1, 3)).astype(jnp.float32)         # (b, H, s, d)
    q = (q * cos + _rotate_half(q) * sin).astype(jnp.bfloat16)
    k = xk.astype(jnp.float32)
    k = (k * cos + _rotate_half(k) * sin).astype(jnp.bfloat16)
    kT = jnp.transpose(k, (0, 2, 1))                                # (b, d, s) pre-transposed K
    v = xv.astype(jnp.bfloat16)

    # TODO(synk): cache_k / cache_v side-effect writes (packed d//8 x 8 layout) not implemented.
    attn = mqa_flash_attention(q, kT, v, start_pos=start_pos)       # (b, s, H*d) lane-dense
    out = linear(attn.reshape(bsz * seqlen, n_head * head_dim), wdense)
    return out.reshape(bsz, seqlen, hidden)


# --------------------------------------------------------------------------
# pure-JAX f32 reference (mirrors the torch prefill path) + main
# --------------------------------------------------------------------------
def _reference(x, start_pos, wqkv, wdense, n_head):
    x = x.astype(jnp.float32)
    b, s, hidden = x.shape
    d = hidden // n_head
    qkv = (x @ wqkv).reshape(b, s, n_head + 2, d)
    xq, xk, xv = qkv[:, :, :n_head, :], qkv[:, :, n_head, :], qkv[:, :, n_head + 1, :]
    cos, sin = _rope_cos_sin(s, d)
    q = jnp.transpose(xq, (0, 2, 1, 3))
    q = q * cos + _rotate_half(q) * sin
    k = xk * cos + _rotate_half(xk) * sin
    scores = jnp.einsum("bhqd,bkd->bhqk", q, k) / math.sqrt(d)
    mask = jnp.triu(jnp.full((s, s), -jnp.inf, dtype=jnp.float32), k=start_pos + 1)
    p = jax.nn.softmax(scores + mask, axis=-1)
    out = jnp.einsum("bhqk,bkd->bhqd", p, xv)
    out = jnp.transpose(out, (0, 2, 1, 3)).reshape(b, s, n_head * d)
    return out @ wdense


if __name__ == "__main__":
    bsz, seqlen, hidden, n_head = 2, 8, 32, 4
    head_dim = hidden // n_head

    key = jax.random.PRNGKey(0)
    kx, kq, kd = jax.random.split(key, 3)
    x = (0.1 * jax.random.normal(kx, (bsz, seqlen, hidden), dtype=jnp.float32)
         ).astype(jnp.bfloat16)
    wqkv = 0.02 * jax.random.normal(kq, (hidden, (n_head + 2) * head_dim), dtype=jnp.float32)
    wdense = 0.02 * jax.random.normal(kd, (n_head * head_dim, hidden), dtype=jnp.float32)

    out = falcon_attention_fused(x, 0, wqkv, wdense, n_head)
    jax.block_until_ready(out)

    assert out.shape == (bsz, seqlen, hidden)
    out_f32 = out.astype(jnp.float32)
    assert bool(jnp.all(jnp.isfinite(out_f32)))

    ref = _reference(x, 0, wqkv, wdense, n_head)
    assert bool(jnp.allclose(out_f32, ref, rtol=8e-2, atol=2e-4)), \
        float(jnp.max(jnp.abs(out_f32 - ref)))

    print("KERNEL_OK")
</pallas_src>

<mosaic_0001>
module attributes {stable_mosaic.version = 11 : i64} {
  func.func @_matmul_kernel(%arg0: i32, %arg1: i32, %arg2: i32, %arg3: memref<16x32xbf16, #tpu.memory_space<vmem>>, %arg4: memref<32x48xbf16, #tpu.memory_space<vmem>>, %arg5: memref<16x48xbf16, #tpu.memory_space<vmem>>, %arg6: memref<16x48xf32, #tpu.memory_space<vmem>>) attributes {dimension_semantics = [#tpu.dimension_semantics<parallel>, #tpu.dimension_semantics<parallel>, #tpu.dimension_semantics<arbitrary>], iteration_bounds = array<i64: 1, 1, 1>, scalar_prefetch = 0 : i64, scratch_operands = 1 : i64, tpu.core_type = #tpu.core_type<tc>, window_params = [{transform_indices = @transform_0, window_bounds = array<i64: 16, 32>}, {transform_indices = @transform_1, window_bounds = array<i64: 32, 48>}, {transform_indices = @transform_2, window_bounds = array<i64: 16, 48>}]} {
    %c0_i32 = arith.constant 0 : i32
    %0 = arith.cmpi eq, %arg2, %c0_i32 : i32
    %1 = arith.extui %0 : i1 to i32
    %c0_i32_0 = arith.constant 0 : i32
    %2 = arith.cmpi ne, %1, %c0_i32_0 : i32
    scf.if %2 {
      %cst_10 = arith.constant 0.000000e+00 : f32
      %12 = vector.broadcast %cst_10 : f32 to vector<16x48xf32>
      %c0_11 = arith.constant 0 : index
      %c0_12 = arith.constant 0 : index
      %13 = vector.load %arg6[%c0_11, %c0_12] : memref<16x48xf32, #tpu.memory_space<vmem>>, vector<16x48xf32>
      tpu.vector_store %arg6[%c0_11, %c0_12], %12 {strides = array<i32>} : memref<16x48xf32, #tpu.memory_space<vmem>>, vector<16x48xf32>,
    } else {
    }
    %c0 = arith.constant 0 : index
    %c0_1 = arith.constant 0 : index
    %3 = vector.load %arg6[%c0, %c0_1] : memref<16x48xf32, #tpu.memory_space<vmem>>, vector<16x48xf32>
    %c0_2 = arith.constant 0 : index
    %c0_3 = arith.constant 0 : index
    %4 = vector.load %arg3[%c0_2, %c0_3] : memref<16x32xbf16, #tpu.memory_space<vmem>>, vector<16x32xbf16>
    %c0_4 = arith.constant 0 : index
    %c0_5 = arith.constant 0 : index
    %5 = vector.load %arg4[%c0_4, %c0_5] : memref<32x48xbf16, #tpu.memory_space<vmem>>, vector<32x48xbf16>
    %cst = arith.constant dense<0.000000e+00> : vector<16x48xf32>
    %6 = tpu.matmul %4, %5, %cst {dimension_numbers = #tpu.dot_dimension_numbers<[1], [0], [0], [1], [0, 0, 1, 1], [], []>} : vector<16x32xbf16>, vector<32x48xbf16>, vector<16x48xf32> -> vector<16x48xf32>
    %7 = arith.addf %3, %6 : vector<16x48xf32>
    %c0_6 = arith.constant 0 : index
    %c0_7 = arith.constant 0 : index
    %8 = vector.load %arg6[%c0_6, %c0_7] : memref<16x48xf32, #tpu.memory_space<vmem>>, vector<16x48xf32>
    tpu.vector_store %arg6[%c0_6, %c0_7], %7 {strides = array<i32>} : memref<16x48xf32, #tpu.memory_space<vmem>>, vector<16x48xf32>,
    %c0_i32_8 = arith.constant 0 : i32
    %9 = arith.cmpi eq, %arg2, %c0_i32_8 : i32
    %10 = arith.extui %9 : i1 to i32
    %c0_i32_9 = arith.constant 0 : i32
    %11 = arith.cmpi ne, %10, %c0_i32_9 : i32
    scf.if %11 {
      %c0_10 = arith.constant 0 : index
      %c0_11 = arith.constant 0 : index
      %12 = vector.load %arg6[%c0_10, %c0_11] : memref<16x48xf32, #tpu.memory_space<vmem>>, vector<16x48xf32>
      %13 = arith.truncf %12 : vector<16x48xf32> to vector<16x48xbf16>
      %c0_12 = arith.constant 0 : index
      %c0_13 = arith.constant 0 : index
      %14 = vector.load %arg5[%c0_12, %c0_13] : memref<16x48xbf16, #tpu.memory_space<vmem>>, vector<16x48xbf16>
      tpu.vector_store %arg5[%c0_12, %c0_13], %13 {strides = array<i32>} : memref<16x48xbf16, #tpu.memory_space<vmem>>, vector<16x48xbf16>,
    } else {
    }
    return
  }
  func.func @transform_0(%arg0: i32, %arg1: i32, %arg2: i32) -> (i32, i32) {
    %c0_i32 = arith.constant 0 : i32
    return %arg0, %arg2 : i32, i32
  }
  func.func @transform_1(%arg0: i32, %arg1: i32, %arg2: i32) -> (i32, i32) {
    %c0_i32 = arith.constant 0 : i32
    return %arg2, %arg1 : i32, i32
  }
  func.func @transform_2(%arg0: i32, %arg1: i32, %arg2: i32) -> (i32, i32) {
    %c0_i32 = arith.constant 0 : i32
    return %arg0, %arg1 : i32, i32
  }
}

</mosaic_0001>

<bundles_post_ra>
// kernel: tpu_custom_call.1
= control target key start
LH: loop header
LB: loop body
LE: loop exit
PB: predicated region body
PF: predicated region fallthrough
CT: control target
= control target key end

     0   :  { %7 = vsyncpa [#allocation4], 0  ;;  %s329_s0 = inlined_call_operand.hbm [shape: bf16[16,32], index: 0, kind: input, shape index: {}]   ;;  %s330_s1 = inlined_call_operand.hbm [shape: bf16[32,48], index: 1, kind: input, shape index: {}]   ;;  %s331_s2 = inlined_call_operand.hbm [shape: bf16[16,48], index: 2, kind: output, shape index: {}]  }
   0x1   :  { %8 = vsyncpa [#allocation7], 0 }
   0x2   :  { %9 = vsyncpa [#allocation5], 0  ;;  %s258_s9 = smov [#allocation3]   ;;  %s186_s13 = scalar_lea.hbm %s329_s0, 128 }
   0x3   :  { %s15_s10 = sshll.u32 %s258_s9, 4  ;;  %p187_p0 = scmp.ne.s32.totalorder %s329_s0, %s186_s13  ;;  %s16_s10 = int_to_ptr.vmem [resolvable:$true] %s15_s10 }
   0x4   :  { %p190_p1 = scmp.lt.u32.totalorder %s186_s13, %s329_s0 }
   0x6   :  { %p192_p2 = pnand %p190_p1, %p187_p0 }
   0x8   :  { %195 = shalt.err (!%p192_p2)
}
   0x9   :  { %s196_s18 = scalar_lea.vmem %s16_s10, 128  ;;  %p201_p4 = scmp.lt.s32.totalorder %s16_s10, %s16_s10 }
   0xa   :  { %p197_p3 = scmp.ne.s32.totalorder %s16_s10, %s196_s18  ;;  %p202_p5 = scmp.lt.s32.totalorder %s196_s18, %s196_s18 }
   0xc   :  { %p203_p6 = por %p202_p5, %p201_p4 }
   0xe   :  { %p204_p7 = pnand %p203_p6, %p197_p3 }
  0x10   :  { %207 = shalt.err (!%p204_p7)
}
  0x11   :  { %s259_s19 = smov 64   ;;  %s260_s20 = smov 4  }
  0x12   :  { %21 = dma.hbm_to_vmem [thread:$0]  %s329_s0, 128, %s16_s10, [#allocation4], %s259_s19, %s259_s19, %s260_s20  }
  0x13   :  { %s261_s23 = smov [#allocation6]   ;;  %s208_s27 = scalar_lea.hbm %s330_s1, 256 }
  0x14   :  { %s27_s24 = sshll.u32 %s261_s23, 4  ;;  %p209_p8 = scmp.ne.s32.totalorder %s330_s1, %s208_s27  ;;  %s28_s24 = int_to_ptr.vmem [resolvable:$true] %s27_s24 }
  0x15   :  { %p212_p9 = scmp.lt.u32.totalorder %s208_s27, %s330_s1 }
  0x17   :  { %p214_p10 = pnand %p212_p9, %p209_p8 }
  0x19   :  { %217 = shalt.err (!%p214_p10)
}
  0x1a   :  { %s218_s4 = scalar_lea.vmem %s28_s24, 256  ;;  %p223_p12 = scmp.lt.s32.totalorder %s28_s24, %s28_s24 }
  0x1b   :  { %p219_p11 = scmp.ne.s32.totalorder %s28_s24, %s218_s4  ;;  %p224_p13 = scmp.lt.s32.totalorder %s218_s4, %s218_s4 }
  0x1d   :  { %p225_p0 = por %p224_p13, %p223_p12 }
  0x1f   :  { %p226_p1 = pnand %p225_p0, %p219_p11 }
  0x21   :  { %229 = shalt.err (!%p226_p1)
}
  0x22   :  { %33 = dma.hbm_to_vmem [thread:$0]  %s330_s1, 256, %s28_s24, [#allocation7], %s259_s19, %s259_s19, %s260_s20  }
  0x23   :  { %252 = dma.done.wait [#allocation4], 128  }
  0x24   :  { %253 = vsyncadd [#allocation4], 4294967168 }
  0x25   :  { %254 = dma.done.wait [#allocation7], 256  }
  0x26   :  { %255 = vsyncadd [#allocation7], 4294967040  ;;  %vm45_vm0 = vcmask 392192   ;;  %v262_v0 = vmov 0.0   ;;  %vm263_vm1 = vmmov 0   ;;  %v183_v1 = vld [vmem:[#allocation6] sm:$0xff]  }
  0x27   :  { %46 = vst.msk [vmem:[#allocation2] sm:$0xff] %vm45_vm0, %v262_v0  ;;  %47 = vst.msk [vmem:[#allocation2 + $0x8] sm:$0xff] %vm45_vm0, %v262_v0  ;;  %168 = vmatprep.subr.bf16.mxu0 %v262_v0  ;;  %172 = vmatprep.mubr.msk.bf16.mxu0 %vm263_vm1, %v262_v0  ;;  %v184_v2 = vld [vmem:[#allocation6 + $0x8] sm:$0xff]   ;;  %v185_v3 = vld [vmem:[#allocation3] sm:$0xff]   ;;  %vm73_vm2 = vcmask 261120   ;;  %vm136_vm3 = vcmask 388096  }
  0x28   :  { %169 = vmatpush3.bf16.msra.mxu0 %v183_v1  ;;  %s264_s1 = smov [#allocation8]  }
  0x29   :  { %170 = vmatprep.subr.bf16.mxu0 %v262_v0  ;;  %s144_s6 = sshll.u32 %s264_s1, 4  ;;  %s145_s6 = int_to_ptr.vmem [resolvable:$true] %s144_s6 }
  0x2a   :  { %s230_s7 = scalar_lea.vmem %s145_s6, 128  ;;  %p235_p3 = scmp.lt.s32.totalorder %s145_s6, %s145_s6 }
  0x2b   :  { %p231_p2 = scmp.ne.s32.totalorder %s145_s6, %s230_s7  ;;  %p236_p4 = scmp.lt.s32.totalorder %s230_s7, %s230_s7 }
  0x2c   :  { %171 = vmatpush3.bf16.msra.mxu0 %v184_v2 }
  0x2d   :  { %p237_p5 = por %p236_p4, %p235_p3 }
  0x2e   :  { %v48_v4 = vld [vmem:[#allocation2] sm:$0xff]  ;;  %v49_v6 = vld [vmem:[#allocation2 + $0x8] sm:$0xff] }
  0x2f   :  { %173 = vmatmul.mubr.msk.bf16.vlgmr.msra.gmra.mrb[0].mxu0 %vm73_vm2, %v185_v3  ;;  %p238_p6 = pnand %p237_p5, %p231_p2 }
 0x102   :  { %v111_v5 = vpop.f32.mrb[0].mxu0 }
 0x103   :  { %v118_v7 = vadd.f32 %v111_v5, %v48_v4  ;;  %v174_v8 = vpop.f32.mrb[1].mxu0 }
 0x104   :  { %v114_v9 = vpop.f32.mrb[2].mxu0 }
 0x105   :  { %121 = vst.msk [vmem:[#allocation2] sm:$0xff] %vm45_vm0, %v118_v7  ;;  %v119_v10 = vadd.f32 %v114_v9, %v49_v6  ;;  %v175_v11 = vpop.f32.mrb[3].mxu0 }
 0x107   :  { %122 = vst.msk [vmem:[#allocation2 + $0x8] sm:$0xff] %vm45_vm0, %v119_v10 }
 0x10c   :  { %v126_v12 = vld [vmem:[#allocation2] sm:$0xff] }
 0x10d   :  { %v163_v13 = vpack.c.bf16 %v126_v12, %v126_v12 }
 0x10e   :  { %v127_v14 = vld [vmem:[#allocation2 + $0x8] sm:$0xff] }
 0x10f   :  { %v164_v15 = vpack.c.bf16 %v127_v14, %v127_v14  ;;  %137 = vst.msk [vmem:[#allocation8] sm:$0xf] %vm136_vm3, %v163_v13 }
 0x111   :  { %138 = vst.msk [vmem:[#allocation8 + $0x4] sm:$0xf] %vm136_vm3, %v164_v15 }
 0x112   :  { %241 = shalt.err (!%p238_p6)
}
 0x113   :  { %s242_s10 = scalar_lea.hbm %s331_s2, 128 }
 0x114   :  { %p243_p7 = scmp.ne.s32.totalorder %s331_s2, %s242_s10  ;;  %p246_p8 = scmp.lt.u32.totalorder %s242_s10, %s331_s2 }
 0x116   :  { %p248_p9 = pnand %p246_p8, %p243_p7 }
 0x118   :  { %251 = shalt.err (!%p248_p9)
}
 0x119   :  { %150 = dma.vmem_to_hbm [thread:$0]  %s145_s6, 128, %s331_s2, [#allocation5], %s259_s19, %s259_s19, %s260_s20  }
 0x11a   :  { %256 = dma.done.wait [#allocation5], 128  }
 0x11b   :  { %257 = vsyncadd [#allocation5], 4294967168 }
 0x11c   :  { %154 = vsyncpa [#allocation4], 1 }
 0x11d   :  { %155 = vsyncpa [#allocation7], 1 }
 0x11e   :  { %156 = vsyncpa [#allocation5], 1 }

</bundles_post_ra>
